<compile_context>
chip_gen: v5e
topology: v5e:2x2
jax: 0.10.0
libtpu: 0.0.40
codegen_flags: <defaults>
</compile_context>

<pallas_src>
from functools import partial

import jax
import jax.numpy as jnp
from jax.experimental import pallas as pl
from jax.experimental.pallas import tpu as pltpu


# ---------------------------------------------------------------------------
# Kernel 1: masked MEAN pooling, grid = (batch tiles, sequence tiles).
# ---------------------------------------------------------------------------
def _mean_pool_kernel(mask_ref, seq_ref, pooled_ref, sum_sc, cnt_sc):
    # mask_ref: (TB, TS) f32   element-wise mask block (handles arbitrary /
    #                          non-contiguous padding, exactly like PyTorch)
    # seq_ref : (TB, TS, H)    native dtype (bf16/f32) — no whole-tile f32 cast
    # pooled_ref: (TB, H)      written once at the last sequence step
    # sum_sc : (TB, H) f32, cnt_sc: (TB, 1) f32  — accumulators across S tiles
    s_idx = pl.program_id(1)

    @pl.when(s_idx == 0)
    def _():
        sum_sc[...] = jnp.zeros_like(sum_sc)
        cnt_sc[...] = jnp.zeros_like(cnt_sc)

    m = mask_ref[...]                                   # (TB, TS) f32 in {0,1}
    seq = seq_ref[...]                                  # (TB, TS, H) native
    masked = seq * m[:, :, None].astype(seq.dtype)      # stays in native dtype
    sum_sc[...] += jnp.sum(masked, axis=1, dtype=jnp.float32)
    cnt_sc[...] += jnp.sum(m, axis=1, keepdims=True, dtype=jnp.float32)

    @pl.when(s_idx == pl.num_programs(1) - 1)
    def _():
        # Exact reciprocal: it only touches (TB, 1) elements, same cost as approx.
        inv = pl.reciprocal(jnp.maximum(cnt_sc[...], 1e-9), approx=False)
        pooled_ref[...] = (sum_sc[...] * inv).astype(pooled_ref.dtype)


def _pick_tiles(batch, seq_len, hidden, itemsize, block_budget_bytes=2 << 20):
    """Pick (TB, TS) so one (TB, TS, H) sequence block stays within ~2 MiB:
    double-buffered inputs plus the in-kernel f32 partial sums then fit the
    default scoped-VMEM limit on v5e (16 MiB), v6e (32 MiB) and v7x
    (32 MiB scoped / 64 MiB physical).
    Constraints: TS is a multiple-of-128 divisor of S (mask lane dim) or S
    itself; TB is a multiple-of-8 divisor of B (sublane dim) or B itself."""
    row_bytes = hidden * itemsize

    # Sequence tile: decouples TB from S so a long sequence never forces the
    # whole batch into one block (old full-batch fallback = OOM hazard).
    ts_cands = [d for d in range(128, seq_len + 1, 128) if seq_len % d == 0]
    ts = seq_len
    if ts_cands:
        fits = [d for d in ts_cands if 8 * d * row_bytes <= block_budget_bytes]
        ts = max(fits) if fits else min(ts_cands)
    # TODO(synk): if S is not a multiple of 128 AND a single (8, S, H) block
    # exceeds the budget, tile the mask lane dim with in-kernel dynamic slices.

    # Batch tile: largest multiple-of-8 divisor that fits; prefer >1 batch
    # grid steps so "parallel" can shard across v7x's two TensorCores.
    tb_cands = [d for d in range(8, batch + 1, 8) if batch % d == 0] or [batch]
    fits = [d for d in tb_cands if d * ts * row_bytes <= block_budget_bytes]
    if fits:
        sub_full = [d for d in fits if d < batch]
        tb = max(sub_full) if sub_full else max(fits)
    else:
        tb = min(tb_cands)
    return tb, ts


def mean_pool(sequence_output, attention_mask):
    """Masked mean pooling, element-wise mask (works for arbitrary padding)."""
    B, S, H = sequence_output.shape
    mask = attention_mask.astype(jnp.float32)           # (B, S)
    TB, TS = _pick_tiles(B, S, H, sequence_output.dtype.itemsize)
    grid = (pl.cdiv(B, TB), pl.cdiv(S, TS))             # exact divisors
    return pl.pallas_call(
        _mean_pool_kernel,
        out_shape=jax.ShapeDtypeStruct((B, H), sequence_output.dtype),
        grid=grid,
        in_specs=[
            pl.BlockSpec((TB, TS), lambda b, s: (b, s)),
            pl.BlockSpec((TB, TS, H), lambda b, s: (b, s, 0)),
        ],
        out_specs=pl.BlockSpec((TB, H), lambda b, s: (b, 0)),
        scratch_shapes=[
            pltpu.VMEM((TB, H), jnp.float32),            # running sum
            pltpu.VMEM((TB, 1), jnp.float32),            # running valid count
        ],
        compiler_params=pltpu.CompilerParams(
            dimension_semantics=("parallel", "arbitrary")),
    )(mask, sequence_output)


# ---------------------------------------------------------------------------
# Kernel 2: pair-classification head (single K=3H matmul on the MXU).
# ---------------------------------------------------------------------------
def _pair_head_kernel(pp_ref, wd_ref, bd_ref, wc_ref, bc_ref, logits_ref):
    # pp_ref: (P, 2, H) pooled pairs, native dtype (pure view of (B, H))
    # wd_ref: (3H, H) bf16, bd_ref: (1, H) f32
    # wc_ref: (H, Lpad) bf16 (lane-dense), bc_ref: (1, Lpad) f32
    pp = pp_ref[...]
    a = pp[:, 0, :]
    b = pp[:, 1, :]
    ab = jnp.abs(a - b)
    # [a, b, |a-b|] concatenated along K -> ONE (P,3H)@(3H,H) MXU stream.
    feats = jnp.concatenate([a, b, ab], axis=-1).astype(jnp.bfloat16)
    h = jnp.dot(feats, wd_ref[...], preferred_element_type=jnp.float32)
    h = h + bd_ref[...]
    h = h * jax.nn.sigmoid(h)                            # SiLU; dropout = identity
    logits = jnp.dot(h.astype(jnp.bfloat16), wc_ref[...],
                     preferred_element_type=jnp.float32)
    logits_ref[...] = logits + bc_ref[...]               # lane-dense store


def prepare_head_params(w_dense, b_dense, w_cls, b_cls):
    """One-time (model-load) weight preprocessing, hoisted out of the jitted
    forward: bf16 cast for the MXU, lane-dense padding of the classifier."""
    H = w_dense.shape[1]
    L = w_cls.shape[1]
    LP = 128 * pl.cdiv(L, 128)
    wd = w_dense.astype(jnp.bfloat16)                                   # (3H, H)
    bd = b_dense.reshape(1, H).astype(jnp.float32)
    wc = jnp.zeros((H, LP), jnp.bfloat16).at[:, :L].set(w_cls.astype(jnp.bfloat16))
    bc = jnp.zeros((1, LP), jnp.float32).at[:, :L].set(
        b_cls.reshape(1, L).astype(jnp.float32))
    return wd, bd, wc, bc


def pair_classification_head(pooled, w_dense_bf16, b_dense_row, w_cls_pad, b_cls_pad):
    B, H = pooled.shape
    P = B // 2
    LP = w_cls_pad.shape[1]
    # (B, H) -> (B//2, 2, H) is a metadata-only, row-major reshape (no copy,
    # no transpose): the pair split happens on values inside the kernel.
    pooled_pairs = pooled.reshape(P, 2, H)
    # TODO(synk): for H >~ 2048 the whole (3H, H) weight (6H^2 bytes) should be
    # K-tiled with a grid + f32 accumulator to respect v7x's 64 MiB VMEM.
    vm = pl.BlockSpec(memory_space=pltpu.MemorySpace.VMEM)
    return pl.pallas_call(
        _pair_head_kernel,
        out_shape=jax.ShapeDtypeStruct((P, LP), jnp.float32),
        in_specs=[vm] * 5,
        out_specs=vm,
    )(pooled_pairs, w_dense_bf16, b_dense_row, w_cls_pad, b_cls_pad)


# ---------------------------------------------------------------------------
# Forward pass (inference): dropout = identity, labels = None -> loss skipped.
# ---------------------------------------------------------------------------
@partial(jax.jit, static_argnames=("num_labels",))
def sentence_embedding_pair_classification_forward(
        sequence_output, attention_mask, w_dense_bf16, b_dense_row,
        w_cls_pad, b_cls_pad, *, num_labels):
    # TODO(synk): the HF AutoModel transformer encoder itself is not defined by
    # the module; its last_hidden_state (sequence_output) is taken as an input.
    pooled = mean_pool(sequence_output, attention_mask)          # (B, H)
    logits_pad = pair_classification_head(
        pooled, w_dense_bf16, b_dense_row, w_cls_pad, b_cls_pad)  # (B//2, Lpad)
    return logits_pad[:, :num_labels]


# ---------------------------------------------------------------------------
# Reference (pure JAX) + demo
# ---------------------------------------------------------------------------
def _reference_forward(sequence_output, attention_mask, w_dense, b_dense,
                       w_cls, b_cls):
    seq = sequence_output.astype(jnp.float32)
    m = attention_mask.astype(jnp.float32)[:, :, None]
    pooled = (seq * m).sum(axis=1) / jnp.maximum(m.sum(axis=1), 1e-9)
    B, H = pooled.shape
    ps = pooled.reshape(B // 2, 2, H)
    a, b = ps[:, 0], ps[:, 1]
    feats = jnp.concatenate([a, b, jnp.abs(a - b)], axis=1)
    h = feats @ w_dense + b_dense
    h = h * jax.nn.sigmoid(h)
    return h @ w_cls + b_cls


if __name__ == "__main__":
    B, S, H, L = 8, 16, 32, 3     # batch must be even (sentence pairs)
    key = jax.random.PRNGKey(0)
    k_seq, k_wd, k_bd, k_wc, k_bc = jax.random.split(key, 5)

    # Encoder output in its native bf16; the pooling kernel reads it as-is.
    sequence_output = jax.random.normal(
        k_seq, (B, S, H), dtype=jnp.float32).astype(jnp.bfloat16)
    lengths = jnp.array([16, 11, 9, 16, 5, 13, 7, 16], dtype=jnp.int32)
    attention_mask = (jnp.arange(S)[None, :] < lengths[:, None]).astype(jnp.float32)
    # Punch a hole in one row: the kernel applies the mask element-wise, so
    # arbitrary (non right-padded) masks match the PyTorch reference exactly.
    attention_mask = attention_mask.at[0, 2].set(0.0)

    # nn.Linear(3H, H) and nn.Linear(H, L) stored as (in, out): y = x @ W + b
    # (equivalent to PyTorch's x @ W_pt.T + b).
    w_dense = jax.random.normal(k_wd, (3 * H, H), dtype=jnp.float32) * 0.05
    b_dense = jax.random.normal(k_bd, (H,), dtype=jnp.float32) * 0.05
    w_cls = jax.random.normal(k_wc, (H, L), dtype=jnp.float32) * 0.05
    b_cls = jax.random.normal(k_bc, (L,), dtype=jnp.float32) * 0.05

    # Model-load-time preprocessing (outside the jitted forward).
    wd_p, bd_p, wc_p, bc_p = prepare_head_params(w_dense, b_dense, w_cls, b_cls)

    logits = sentence_embedding_pair_classification_forward(
        sequence_output, attention_mask, wd_p, bd_p, wc_p, bc_p, num_labels=L)
    jax.block_until_ready(logits)
    assert logits.shape == (B // 2, L), logits.shape

    ref = _reference_forward(sequence_output, attention_mask,
                             w_dense, b_dense, w_cls, b_cls)
    assert jnp.allclose(logits, ref, atol=2e-2, rtol=2e-2), (
        float(jnp.max(jnp.abs(logits - ref))))
    print("KERNEL_OK")
</pallas_src>

<mosaic_0001>
module attributes {stable_mosaic.version = 11 : i64} {
  func.func @_mean_pool_kernel(%arg0: i32, %arg1: i32, %arg2: memref<8x16xf32, #tpu.memory_space<vmem>>, %arg3: memref<8x16x32xbf16, #tpu.memory_space<vmem>>, %arg4: memref<8x32xbf16, #tpu.memory_space<vmem>>, %arg5: memref<8x32xf32, #tpu.memory_space<vmem>>, %arg6: memref<8x1xf32, #tpu.memory_space<vmem>>) attributes {dimension_semantics = [#tpu.dimension_semantics<parallel>, #tpu.dimension_semantics<arbitrary>], iteration_bounds = array<i64: 1, 1>, scalar_prefetch = 0 : i64, scratch_operands = 2 : i64, tpu.core_type = #tpu.core_type<tc>, window_params = [{transform_indices = @transform_0, window_bounds = array<i64: 8, 16>}, {transform_indices = @transform_1, window_bounds = array<i64: 8, 16, 32>}, {transform_indices = @transform_2, window_bounds = array<i64: 8, 32>}]} {
    %c0_i32 = arith.constant 0 : i32
    %0 = arith.cmpi eq, %arg1, %c0_i32 : i32
    %1 = arith.extui %0 : i1 to i32
    %c0_i32_0 = arith.constant 0 : i32
    %2 = arith.cmpi ne, %1, %c0_i32_0 : i32
    scf.if %2 {
      %cst_16 = arith.constant 0.000000e+00 : f32
      %22 = vector.broadcast %cst_16 : f32 to vector<8x32xf32>
      %c0_17 = arith.constant 0 : index
      %c0_18 = arith.constant 0 : index
      %23 = vector.load %arg5[%c0_17, %c0_18] : memref<8x32xf32, #tpu.memory_space<vmem>>, vector<8x32xf32>
      tpu.vector_store %arg5[%c0_17, %c0_18], %22 {strides = array<i32>} : memref<8x32xf32, #tpu.memory_space<vmem>>, vector<8x32xf32>,
      %cst_19 = arith.constant 0.000000e+00 : f32
      %24 = vector.broadcast %cst_19 : f32 to vector<8x1xf32>
      %c0_20 = arith.constant 0 : index
      %c0_21 = arith.constant 0 : index
      %25 = vector.load %arg6[%c0_20, %c0_21] : memref<8x1xf32, #tpu.memory_space<vmem>>, vector<8x1xf32>
      tpu.vector_store %arg6[%c0_20, %c0_21], %24 {strides = array<i32>} : memref<8x1xf32, #tpu.memory_space<vmem>>, vector<8x1xf32>,
    } else {
    }
    %c0 = arith.constant 0 : index
    %c0_1 = arith.constant 0 : index
    %3 = vector.load %arg2[%c0, %c0_1] : memref<8x16xf32, #tpu.memory_space<vmem>>, vector<8x16xf32>
    %c0_2 = arith.constant 0 : index
    %c0_3 = arith.constant 0 : index
    %c0_4 = arith.constant 0 : index
    %4 = vector.load %arg3[%c0_2, %c0_3, %c0_4] : memref<8x16x32xbf16, #tpu.memory_space<vmem>>, vector<8x16x32xbf16>
    %5 = vector.shape_cast %3 : vector<8x16xf32> to vector<8x16x1xf32>
    %6 = arith.truncf %5 : vector<8x16x1xf32> to vector<8x16x1xbf16>
    %7 = vector.broadcast %6 : vector<8x16x1xbf16> to vector<8x16x32xbf16>
    %8 = arith.mulf %4, %7 : vector<8x16x32xbf16>
    %c0_5 = arith.constant 0 : index
    %c0_6 = arith.constant 0 : index
    %9 = vector.load %arg5[%c0_5, %c0_6] : memref<8x32xf32, #tpu.memory_space<vmem>>, vector<8x32xf32>
    %10 = arith.extf %8 : vector<8x16x32xbf16> to vector<8x16x32xf32>
    %cst = arith.constant dense<0.000000e+00> : vector<8x32xf32>
    %11 = vector.multi_reduction <add>, %10, %cst [1] : vector<8x16x32xf32> to vector<8x32xf32>
    %12 = arith.addf %9, %11 : vector<8x32xf32>
    %c0_7 = arith.constant 0 : index
    %c0_8 = arith.constant 0 : index
    %13 = vector.load %arg5[%c0_7, %c0_8] : memref<8x32xf32, #tpu.memory_space<vmem>>, vector<8x32xf32>
    tpu.vector_store %arg5[%c0_7, %c0_8], %12 {strides = array<i32>} : memref<8x32xf32, #tpu.memory_space<vmem>>, vector<8x32xf32>,
    %c0_9 = arith.constant 0 : index
    %c0_10 = arith.constant 0 : index
    %14 = vector.load %arg6[%c0_9, %c0_10] : memref<8x1xf32, #tpu.memory_space<vmem>>, vector<8x1xf32>
    %cst_11 = arith.constant dense<0.000000e+00> : vector<8xf32>
    %15 = vector.multi_reduction <add>, %3, %cst_11 [1] : vector<8x16xf32> to vector<8xf32>
    %16 = vector.shape_cast %15 : vector<8xf32> to vector<8x1xf32>
    %17 = arith.addf %14, %16 : vector<8x1xf32>
    %c0_12 = arith.constant 0 : index
    %c0_13 = arith.constant 0 : index
    %18 = vector.load %arg6[%c0_12, %c0_13] : memref<8x1xf32, #tpu.memory_space<vmem>>, vector<8x1xf32>
    tpu.vector_store %arg6[%c0_12, %c0_13], %17 {strides = array<i32>} : memref<8x1xf32, #tpu.memory_space<vmem>>, vector<8x1xf32>,
    %c0_i32_14 = arith.constant 0 : i32
    %19 = arith.cmpi eq, %arg1, %c0_i32_14 : i32
    %20 = arith.extui %19 : i1 to i32
    %c0_i32_15 = arith.constant 0 : i32
    %21 = arith.cmpi ne, %20, %c0_i32_15 : i32
    scf.if %21 {
      %c0_16 = arith.constant 0 : index
      %c0_17 = arith.constant 0 : index
      %22 = vector.load %arg6[%c0_16, %c0_17] : memref<8x1xf32, #tpu.memory_space<vmem>>, vector<8x1xf32>
      %cst_18 = arith.constant 9.99999971E-10 : f32
      %23 = vector.broadcast %cst_18 : f32 to vector<8x1xf32>
      %24 = arith.maximumf %22, %23 : vector<8x1xf32>
      %25 = tpu.reciprocal %24 : vector<8x1xf32> -> vector<8x1xf32>
      %c0_19 = arith.constant 0 : index
      %c0_20 = arith.constant 0 : index
      %26 = vector.load %arg5[%c0_19, %c0_20] : memref<8x32xf32, #tpu.memory_space<vmem>>, vector<8x32xf32>
      %27 = vector.broadcast %25 : vector<8x1xf32> to vector<8x32xf32>
      %28 = arith.mulf %26, %27 : vector<8x32xf32>
      %29 = arith.truncf %28 : vector<8x32xf32> to vector<8x32xbf16>
      %c0_21 = arith.constant 0 : index
      %c0_22 = arith.constant 0 : index
      %30 = vector.load %arg4[%c0_21, %c0_22] : memref<8x32xbf16, #tpu.memory_space<vmem>>, vector<8x32xbf16>
      tpu.vector_store %arg4[%c0_21, %c0_22], %29 {strides = array<i32>} : memref<8x32xbf16, #tpu.memory_space<vmem>>, vector<8x32xbf16>,
    } else {
    }
    return
  }
  func.func @transform_0(%arg0: i32, %arg1: i32) -> (i32, i32) {
    %c0_i32 = arith.constant 0 : i32
    return %arg0, %arg1 : i32, i32
  }
  func.func @transform_1(%arg0: i32, %arg1: i32) -> (i32, i32, i32) {
    %c0_i32 = arith.constant 0 : i32
    %c0_i32_0 = arith.constant 0 : i32
    return %arg0, %arg1, %c0_i32 : i32, i32, i32
  }
  func.func @transform_2(%arg0: i32, %arg1: i32) -> (i32, i32) {
    %c0_i32 = arith.constant 0 : i32
    %c0_i32_0 = arith.constant 0 : i32
    return %arg0, %c0_i32 : i32, i32
  }
}

module attributes {stable_mosaic.version = 11 : i64} {
  func.func @_pair_head_kernel(%arg0: memref<4x2x32xbf16, #tpu.memory_space<vmem>>, %arg1: memref<96x32xbf16, #tpu.memory_space<vmem>>, %arg2: memref<1x32xf32, #tpu.memory_space<vmem>>, %arg3: memref<32x128xbf16, #tpu.memory_space<vmem>>, %arg4: memref<1x128xf32, #tpu.memory_space<vmem>>, %arg5: memref<4x128xf32, #tpu.memory_space<vmem>>) attributes {dimension_semantics = [], scalar_prefetch = 0 : i64, scratch_operands = 0 : i64, tpu.core_type = #tpu.core_type<tc>} {
    %c0 = arith.constant 0 : index
    %c0_0 = arith.constant 0 : index
    %c0_1 = arith.constant 0 : index
    %0 = vector.load %arg0[%c0, %c0_0, %c0_1] : memref<4x2x32xbf16, #tpu.memory_space<vmem>>, vector<4x2x32xbf16>
    %1 = vector.extract_strided_slice %0 {offsets = [0, 0, 0], sizes = [4, 1, 32], strides = [1, 1, 1]} : vector<4x2x32xbf16> to vector<4x1x32xbf16>
    %2 = vector.shape_cast %1 : vector<4x1x32xbf16> to vector<4x32xbf16>
    %3 = vector.extract_strided_slice %0 {offsets = [0, 1, 0], sizes = [4, 1, 32], strides = [1, 1, 1]} : vector<4x2x32xbf16> to vector<4x1x32xbf16>
    %4 = vector.shape_cast %3 : vector<4x1x32xbf16> to vector<4x32xbf16>
    %5 = arith.subf %2, %4 : vector<4x32xbf16>
    %6 = math.absf %5 : vector<4x32xbf16>
    %7 = tpu.concatenate %2, %4, %6 in 1 : vector<4x32xbf16>, vector<4x32xbf16>, vector<4x32xbf16> -> vector<4x96xbf16>
    %c0_2 = arith.constant 0 : index
    %c0_3 = arith.constant 0 : index
    %8 = vector.load %arg1[%c0_2, %c0_3] : memref<96x32xbf16, #tpu.memory_space<vmem>>, vector<96x32xbf16>
    %cst = arith.constant dense<0.000000e+00> : vector<4x32xf32>
    %9 = tpu.matmul %7, %8, %cst {dimension_numbers = #tpu.dot_dimension_numbers<[1], [0], [0], [1], [0, 0, 1, 1], [], []>} : vector<4x96xbf16>, vector<96x32xbf16>, vector<4x32xf32> -> vector<4x32xf32>
    %c0_4 = arith.constant 0 : index
    %c0_5 = arith.constant 0 : index
    %10 = vector.load %arg2[%c0_4, %c0_5] : memref<1x32xf32, #tpu.memory_space<vmem>>, vector<1x32xf32>
    %11 = vector.broadcast %10 : vector<1x32xf32> to vector<4x32xf32>
    %12 = arith.addf %9, %11 : vector<4x32xf32>
    %13 = arith.negf %12 : vector<4x32xf32>
    %14 = math.exp %13 : vector<4x32xf32>
    %cst_6 = arith.constant 1.000000e+00 : f32
    %15 = vector.broadcast %cst_6 : f32 to vector<4x32xf32>
    %16 = arith.addf %15, %14 : vector<4x32xf32>
    %17 = arith.divf %15, %16 : vector<4x32xf32>
    %18 = arith.mulf %12, %17 : vector<4x32xf32>
    %19 = arith.truncf %18 : vector<4x32xf32> to vector<4x32xbf16>
    %c0_7 = arith.constant 0 : index
    %c0_8 = arith.constant 0 : index
    %20 = vector.load %arg3[%c0_7, %c0_8] : memref<32x128xbf16, #tpu.memory_space<vmem>>, vector<32x128xbf16>
    %cst_9 = arith.constant dense<0.000000e+00> : vector<4x128xf32>
    %21 = tpu.matmul %19, %20, %cst_9 {dimension_numbers = #tpu.dot_dimension_numbers<[1], [0], [0], [1], [0, 0, 1, 1], [], []>} : vector<4x32xbf16>, vector<32x128xbf16>, vector<4x128xf32> -> vector<4x128xf32>
    %c0_10 = arith.constant 0 : index
    %c0_11 = arith.constant 0 : index
    %22 = vector.load %arg4[%c0_10, %c0_11] : memref<1x128xf32, #tpu.memory_space<vmem>>, vector<1x128xf32>
    %23 = vector.broadcast %22 : vector<1x128xf32> to vector<4x128xf32>
    %24 = arith.addf %21, %23 : vector<4x128xf32>
    %c0_12 = arith.constant 0 : index
    %c0_13 = arith.constant 0 : index
    %25 = vector.load %arg5[%c0_12, %c0_13] : memref<4x128xf32, #tpu.memory_space<vmem>>, vector<4x128xf32>
    tpu.vector_store %arg5[%c0_12, %c0_13], %24 {strides = array<i32>} : memref<4x128xf32, #tpu.memory_space<vmem>>, vector<4x128xf32>,
    return
  }
}

</mosaic_0001>

<bundles_post_ra>
// kernel: sentence_embedding_pair_classification_forward.3
= control target key start
LH: loop header
LB: loop body
LE: loop exit
PB: predicated region body
PF: predicated region fallthrough
CT: control target
= control target key end

     0   :  { %s466_s0 = inlined_call_operand.vmem [shape: bf16[4,2,32], index: 0, kind: input, shape index: {}]   ;;  %s467_s1 = inlined_call_operand.vmem [shape: bf16[96,32], index: 1, kind: input, shape index: {}]   ;;  %s468_s2 = inlined_call_operand.vmem [shape: f32[1,32], index: 2, kind: input, shape index: {}]   ;;  %s469_s3 = inlined_call_operand.vmem [shape: bf16[32,128], index: 3, kind: input, shape index: {}]   ;;  %s470_s4 = inlined_call_operand.vmem [shape: f32[1,128], index: 4, kind: input, shape index: {}]   ;;  %s471_s5 = inlined_call_operand.hbm [shape: f32[4,128], index: 5, kind: output, shape index: {}]  }
   0x1   :  { %v22_v0 = vld [vmem:[%s466_s0] sm:$0x1] }
   0x2   :  { %59 = vst [vmem:[#allocation1] ss:$9 sm:$0xff] %v22_v0 }
   0x3   :  { %10 = vsyncpa [#allocation3], 0  ;;  %v23_v1 = vld [vmem:[%s466_s0 + $0x1] sm:$0x1]  ;;  %v24_v3 = vld [vmem:[%s466_s0 + $0x2] sm:$0x1]  ;;  %v26_v17 = vunpack.c.l.bf16 %v22_v0 }
   0x4   :  { %vm79_vm0 = vcmask 1041409   ;;  %v25_v9 = vld [vmem:[%s466_s0 + $0x3] sm:$0x1]  ;;  %vm82_vm1 = vcmask 1042434   ;;  %v27_v15 = vunpack.c.l.bf16 %v23_v1  ;;  %v28_v16 = vunpack.c.l.bf16 %v24_v3  ;;  %v335_v32 = vld [vmem:[%s467_s1 + $0x28] sm:$0xff]  ;;  %v333_v40 = vld [vmem:[%s467_s1 + $0x18] sm:$0xff] }
   0x5   :  { %v29_v21 = vunpack.c.l.bf16 %v25_v9  ;;  %vm85_vm2 = vcmask 1043459   ;;  %v287_v24 = vrot.slane %v26_v17, 9  ;;  %202 = vmatpush.bf16.msra.mxu0 %v335_v32  ;;  %v334_v35 = vld [vmem:[%s467_s1 + $0x20] sm:$0xff]  ;;  %v332_v48 = vld [vmem:[%s467_s1 + $0x10] sm:$0xff]  ;;  %s373_s8 = smov 32   ;;  %s374_s9 = smov 64  }
   0x6   :  { %v288_v18 = vrot.slane %v27_v15, 9  ;;  %v289_v23 = vrot.slane %v28_v16, 9  ;;  %vm138_vm3 = vcmask 261120   ;;  %vm142_vm4 = vcmask 523264   ;;  %s375_s19 = smov [#allocation2]   ;;  %s278_s23 = sshll.u32 %s471_s5, 4  ;;  %s279_s23 = int_to_ptr.hbm [resolvable:$true] %s278_s23 }
   0x7   :  { %v290_v27 = vrot.slane %v29_v21, 9  ;;  %v46_v29 = vsub.f32 %v26_v17, %v287_v24  ;;  %vm197_vm5 = vcmask 785408   ;;  %v336_v17 = vld [vmem:[%s469_s3] sm:$0xff]  ;;  %s276_s20 = sshll.u32 %s375_s19, 4  ;;  %s277_s20 = int_to_ptr.vmem [resolvable:$true] %s276_s20 }
   0x8   :  { %v47_v25 = vsub.f32 %v27_v15, %v288_v18  ;;  %v48_v28 = vsub.f32 %v28_v16, %v289_v23  ;;  %v337_v15 = vld [vmem:[%s469_s3 + $0x8] sm:$0xff]  ;;  %v341_v16 = vld [vmem:[%s468_s2] ss:$0 sm:$0xff] }
   0x9   :  { %v60_v2 = vld [vmem:[#allocation1] sm:$0xf]  ;;  %v49_v33 = vsub.f32 %v29_v21, %v290_v27  ;;  %v50_v36 = vpack.c.bf16 %v46_v29, %v46_v29  ;;  %203 = vmatpush.bf16.msra.mxu0 %v334_v35  ;;  %263 = vmatpush.bf16.msra.mxu1 %v337_v15 }
   0xa   :  { %63 = vst [vmem:[#allocation1] ss:$9 sm:$0xff] %v23_v1  ;;  %v74_v5 = vunpack.c.l.b16 %v60_v2  ;;  %v51_v30 = vpack.c.bf16 %v47_v25, %v47_v25  ;;  %v52_v34 = vpack.c.bf16 %v48_v28, %v48_v28 }
   0xb   :  { %v53_v38 = vpack.c.bf16 %v49_v33, %v49_v33  ;;  %v54_v42 = vand.u32 2147450879, %v50_v36  ;;  %v342_v36 = vld [vmem:[%s470_s4] ss:$0 sm:$0xff] }
   0xc   :  { %v55_v37 = vand.u32 2147450879, %v51_v30  ;;  %v56_v39 = vand.u32 2147450879, %v52_v34 }
   0xd   :  { %v57_v45 = vand.u32 2147450879, %v53_v38  ;;  %204 = vmatpush.bf16.msra.mxu0 %v333_v40  ;;  %v117_v51 = vunpack.c.l.b16 %v54_v42  ;;  %264 = vmatpush.bf16.msra.mxu1 %v336_v17 }
   0xe   :  { %v118_v43 = vunpack.c.l.b16 %v55_v37  ;;  %v119_v47 = vunpack.c.l.b16 %v56_v39 }
   0xf   :  { %v120_v53 = vunpack.c.l.b16 %v57_v45  ;;  %v291_v57 = vunpack.i.l.s16 %v117_v51 }
  0x10   :  { %v292_v52 = vunpack.i.l.s16 %v118_v43  ;;  %v293_v55 = vunpack.i.l.s16 %v119_v47 }
  0x11   :  { %v64_v4 = vld [vmem:[#allocation1] sm:$0xf]  ;;  %205 = vmatpush.bf16.msra.mxu0 %v332_v48  ;;  %v294_v61 = vunpack.i.l.s16 %v120_v53 }
  0x12   :  { %67 = vst [vmem:[#allocation1] ss:$9 sm:$0xff] %v24_v3  ;;  %v75_v6 = vunpack.c.l.b16 %v64_v4  ;;  %v129_v58 = vrot.slane %v292_v52, 7  ;;  %v131_v63 = vrot.slane %v293_v55, 6 }
  0x14   :  { %v78_v7 = vrot.slane %v75_v6, 7 }
  0x16   :  { %v80_v8 = vsel %vm79_vm0, %v78_v7, %v74_v5 }
  0x19   :  { %v68_v10 = vld [vmem:[#allocation1] sm:$0xf] }
  0x1a   :  { %71 = vst [vmem:[#allocation1] ss:$9 sm:$0xff] %v25_v9  ;;  %v76_v11 = vunpack.c.l.b16 %v68_v10 }
  0x1c   :  { %v81_v12 = vrot.slane %v76_v11, 6 }
  0x1e   :  { %v83_v13 = vsel %vm82_vm1, %v81_v12, %v80_v8  ;;  %v331_v8 = vld [vmem:[%s467_s1 + $0x8] sm:$0xff] }
  0x1f   :  { %206 = vmatpush.bf16.msra.mxu0 %v331_v8 }
  0x21   :  { %v72_v14 = vld [vmem:[#allocation1] sm:$0xf] }
  0x22   :  { %88 = vst [vmem:[#allocation1] ss:$9 sm:$0xff] %v22_v0  ;;  %v77_v20 = vunpack.c.l.b16 %v72_v14 }
  0x24   :  { %v84_v22 = vrot.slane %v77_v20, 5 }
  0x26   :  { %v421_v26 = vsel %vm85_vm2, %v84_v22, %v83_v13 }
  0x27   :  { %v87_v11 = vpack.c.b16 %v421_v26, %v421_v26 }
  0x29   :  { %v89_v19 = vld [vmem:[#allocation1] sm:$0xf] }
  0x2a   :  { %91 = vst [vmem:[#allocation1] ss:$9 sm:$0xff] %v23_v1  ;;  %v100_v41 = vunpack.c.l.b16 %v89_v19  ;;  %v130_v1 = vsel %vm79_vm0, %v129_v58, %v291_v57 }
  0x2b   :  { %v132_v5 = vsel %vm82_vm1, %v131_v63, %v130_v1 }
  0x2c   :  { %v104_v50 = vrot.slane %v100_v41, 1 }
  0x31   :  { %v92_v31 = vld [vmem:[#allocation1] sm:$0xf] }
  0x32   :  { %94 = vst [vmem:[#allocation1] ss:$9 sm:$0xff] %v24_v3  ;;  %v101_v49 = vunpack.c.l.b16 %v92_v31  ;;  %v133_v3 = vrot.slane %v294_v61, 5 }
  0x34   :  { %v105_v56 = vsel %vm79_vm0, %v101_v49, %v104_v50  ;;  %v134_v6 = vsel %vm85_vm2, %v133_v3, %v132_v5 }
  0x35   :  { %v135_v7 = vpack.c.b16 %v134_v6, %v134_v6 }
  0x39   :  { %v95_v44 = vld [vmem:[#allocation1] sm:$0xf] }
  0x3a   :  { %97 = vst [vmem:[#allocation1] ss:$9 sm:$0xff] %v25_v9  ;;  %v102_v46 = vunpack.c.l.b16 %v95_v44  ;;  %v330_v9 = vld [vmem:[%s467_s1] sm:$0xff] }
  0x3b   :  { %207 = vmatpush.bf16.msra.mxu0 %v330_v9 }
  0x3c   :  { %v106_v54 = vrot.slane %v102_v46, 7 }
  0x3e   :  { %v107_v62 = vsel %vm82_vm1, %v106_v54, %v105_v56 }
  0x41   :  { %v98_v59 = vld [vmem:[#allocation1] sm:$0xf] }
  0x42   :  { %v103_v60 = vunpack.c.l.b16 %v98_v59 }
  0x44   :  { %v108_v0 = vrot.slane %v103_v60, 6 }
  0x46   :  { %v109_v2 = vsel %vm85_vm2, %v108_v0, %v107_v62 }
  0x47   :  { %v110_v4 = vpack.c.b16 %v109_v2, %v109_v2 }
  0x49   :  { %111 = vrot.lane.b32.xlu0 %v110_v4, %s373_s8 }
  0x51   :  { %136 = vrot.lane.b32.xlu0 %v135_v7, %s374_s9 }
  0xbb   :  { %v112_v10 = vpop.permute.xlu0 %111 }
  0xbc   :  { %v141_v12 = vsel %vm138_vm3, %v87_v11, %v112_v10 }
  0xc3   :  { %v137_v13 = vpop.permute.xlu0 %136 }
  0xc4   :  { %v144_v14 = vsel %vm142_vm4, %v141_v12, %v137_v13 }
  0xc5   :  { %319 = vmatmul.msk.bf16.vlgmr.msra.gmra.mxu0 %vm197_vm5, %v144_v14 }
 0x142   :  { %v209_v18 = vpop.f32.mrf.mxu0 }
 0x143   :  { %v210_v19 = vadd.f32 %v341_v16, %v209_v18 }
 0x145   :  { %v320_v20 = vmul.f32 -1.442695, %v210_v19 }
 0x147   :  { %343 = vpow2.f32 %v320_v20 }
 0x14a   :  { %v211_v21 = vpop.f32.mrf.mxu0 }
 0x14d   :  { %v344_v22 = vpop.eup %343 }
 0x14e   :  { %v216_v23 = vadd.f32 1.0, %v344_v22 }
 0x150   :  { %345 = vrcp.f32 %v216_v23  ;;  %v228_v27 = vand.u32 2147483648, %v216_v23  ;;  %v226_v29 = vand.u32 2147483647, %v216_v23  ;;  %vm222_vm7 = vweird.f32 %v216_v23 }
 0x152   :  { %v229_v31 = vor.u32 1.1754944e-38, %v228_v27  ;;  %vm227_vm9 = vcmp.eq.f32.partialorder %v226_v29, 8.507059e+37 }
 0x156   :  { %v346_v24 = vpop.eup %345 }
 0x157   :  { %v218_v25 = vmul.f32 %v346_v24, %v216_v23  ;;  %vm223_vm6 = vweird.f32 %v346_v24 }
 0x158   :  { %vm224_vm8 = vmor %vm222_vm7, %vm223_vm6 }
 0x159   :  { %v219_v26 = vsub.f32 1.0, %v218_v25 }
 0x15b   :  { %v220_v28 = vmul.f32 %v346_v24, %v219_v26 }
 0x15d   :  { %v221_v30 = vadd.f32 %v346_v24, %v220_v28 }
 0x15f   :  { %v225_v32 = vsel %vm224_vm8, %v346_v24, %v221_v30 }
 0x160   :  { %v230_v33 = vsel %vm227_vm9, %v229_v31, %v225_v32 }
 0x161   :  { %v232_v34 = vmul.f32 %v230_v33, %v210_v19 }
 0x163   :  { %v233_v35 = vpack.c.bf16 %v232_v34, %v232_v34 }
 0x165   :  { %329 = vmatmul.msk.bf16.vlgmr.msra.gmra.mxu1 %vm138_vm3, %v233_v35 }
 0x1e2   :  { %v266_v37 = vpop.f32.mrf.mxu1 }
 0x1e3   :  { %v267_v38 = vadd.f32 %v342_v36, %v266_v37 }
 0x1e5   :  { %270 = vst [vmem:[#allocation2] sm:$0xf] %v267_v38 }
 0x1e6   :  { %281 = dma.vmem_to_hbm [thread:$0]  %s277_s20, 64, %s279_s23, [#allocation3]  }
 0x1ea   :  { %v268_v39 = vpop.f32.mrf.mxu1 }
 0x1eb   :  { %371 = dma.done.wait [#allocation3], 64  }
 0x1ec   :  { %372 = vsyncadd [#allocation3], 4294967232 }
 0x1ed   :  { %286 = vsyncpa [#allocation3], 1 }

// kernel: sentence_embedding_pair_classification_forward.2
= control target key start
LH: loop header
LB: loop body
LE: loop exit
PB: predicated region body
PF: predicated region fallthrough
CT: control target
= control target key end

     0   :  { %7 = vsyncpa [#allocation5], 0  ;;  %s649_s0 = inlined_call_operand.hbm [shape: f32[8,16], index: 0, kind: input, shape index: {}]   ;;  %s650_s1 = inlined_call_operand.hbm [shape: bf16[8,16,32], index: 1, kind: input, shape index: {}]   ;;  %s651_s2 = inlined_call_operand.vmem [shape: bf16[8,32], index: 2, kind: output, shape index: {}]  }
   0x1   :  { %s14_s11 = sshll.u32 %s649_s0, 4  ;;  %s15_s11 = int_to_ptr.hbm [resolvable:$true] %s14_s11 }
   0x2   :  { %8 = vsyncpa [#allocation7], 0  ;;  %s546_s12 = smov [#allocation4]   ;;  %s24_s16 = sshll.u32 %s650_s1, 4  ;;  %s25_s16 = int_to_ptr.hbm [resolvable:$true] %s24_s16 }
   0x3   :  { %s16_s13 = sshll.u32 %s546_s12, 4  ;;  %s547_s17 = smov [#allocation6]   ;;  %s17_s13 = int_to_ptr.vmem [resolvable:$true] %s16_s13 }
   0x4   :  { %19 = dma.hbm_to_vmem [thread:$0]  %s15_s11, 128, %s17_s13, [#allocation5]  }
   0x5   :  { %s26_s18 = sshll.u32 %s547_s17, 4  ;;  %s548_s19 = smov 64   ;;  %s27_s18 = int_to_ptr.vmem [resolvable:$true] %s26_s18 }
   0x6   :  { %s549_s20 = smov 4  }
   0x7   :  { %32 = dma.hbm_to_vmem [thread:$0]  %s25_s16, 1024, %s27_s18, [#allocation7], %s548_s19, %s548_s19, %s549_s20  }
   0x8   :  { %542 = dma.done.wait [#allocation5], 128  }
   0x9   :  { %543 = vsyncadd [#allocation5], 4294967168 }
   0xa   :  { %544 = dma.done.wait [#allocation7], 1024  }
   0xb   :  { %545 = vsyncadd [#allocation7], 4294966272  ;;  %v67_v0 = vlaneseq  ;;  %vm358_vm0 = vcmask 130048   ;;  %v49_v3 = vld [vmem:[#allocation4] sm:$0xff]  ;;  %vm45_vm1 = vcmask 261120   ;;  %vm47_vm2 = vcmask 7168  }
   0xc   :  { %v359_v4 = vsel %vm358_vm0, %v49_v3, 0.0  ;;  %v66_v5 = vperm.slane %v49_v3, 0  ;;  %v79_v6 = vperm.slane %v49_v3, 1  ;;  %v118_v7 = vperm.slane %v49_v3, 4  ;;  %v435_v25 = vld [vmem:[#allocation6 + $0x20] sm:$0xff]   ;;  %v436_v26 = vld [vmem:[#allocation6 + $0x28] sm:$0xff]  }
   0xd   :  { %v68_v1 = vshrl.u32 %v67_v0, 7  ;;  %360 = vadd.xlane.f32.xlu1 %v359_v4  ;;  %v131_v8 = vperm.slane %v49_v3, 5  ;;  %v550_v11 = vmov 0.0   ;;  %v92_v12 = vperm.slane %v49_v3, 2  ;;  %v576_v50 = vld [vmem:[#allocation6 + $0x10] sm:$0xff]   ;;  %v578_v51 = vld [vmem:[#allocation6 + $0x18] sm:$0xff]  }
   0xe   :  { %v446_v9 = vpack.i.bf16 %v79_v6, %v66_v5  ;;  %46 = vst.msk [vmem:[#allocation2] sm:$0xff] %vm45_vm1, %v550_v11  ;;  %v105_v13 = vperm.slane %v49_v3, 3  ;;  %v144_v15 = vperm.slane %v49_v3, 6  ;;  %v157_v16 = vperm.slane %v49_v3, 7  ;;  %v580_v53 = vld [vmem:[#allocation6] sm:$0xff]   ;;  %v582_v54 = vld [vmem:[#allocation6 + $0x8] sm:$0xff]  }
   0xf   :  { %v75_v2 = vadd.s32 8, %v68_v1  ;;  %463 = vset.pattern.permute.xlu2 %v68_v1  ;;  %457 = vset.pattern.permute.xlu1 %v68_v1  ;;  %v464_v10 = vpack.i.bf16 %v131_v8, %v118_v7  ;;  %48 = vst.msk [vmem:[#allocation3] sm:$0xff] %vm47_vm2, %v550_v11  ;;  %v551_v18 = vmov 0   ;;  %v418_v30 = vunpack.c.l.bf16 %v435_v25 }
  0x10   :  { %v470_v14 = vpack.i.bf16 %v105_v13, %v92_v12  ;;  %v480_v17 = vpack.i.bf16 %v157_v16, %v144_v15  ;;  %v422_v31 = vunpack.c.l.bf16 %v436_v26  ;;  %v419_v39 = vunpack.c.h.bf16 %v435_v25 }
  0x11   :  { %445 = vset.pattern.permute.xlu0 %v75_v2  ;;  %v423_v40 = vunpack.c.h.bf16 %v436_v26  ;;  %v411_v62 = vunpack.c.h.bf16 %v576_v50  ;;  %v407_v3 = vunpack.c.h.bf16 %v582_v54  ;;  %vm340_vm7 = vcmask 1041409  }
  0x12   :  { %vm342_vm8 = vcmask 1042434   ;;  %vm344_vm9 = vcmask 1043459   ;;  %vm346_vm10 = vcmask 1044484   ;;  %vm348_vm11 = vcmask 1045509  }
  0x13   :  { %vm350_vm12 = vcmask 1046534   ;;  %vm352_vm13 = vcmask 1047559   ;;  %vm392_vm14 = vcmask 257024  }
  0x16   :  { %v357_v23 = vld [vmem:[#allocation3] sm:$0xff] }
  0x17   :  { %465 = vperm.xlu2 %463, %v464_v10  }
  0x19   :  { %447 = vperm.xlu0 %445, %v446_v9  }
  0x1f   :  { %469 = vset.pattern.permute.xlu2 %v75_v2  ;;  %v403_v2 = vunpack.c.h.bf16 %v580_v53 }
  0x21   :  { %451 = vset.pattern.permute.xlu0 %v68_v1  ;;  %v415_v1 = vunpack.c.h.bf16 %v578_v51 }
  0x26   :  { %459 = vperm.xlu1 %457, %v470_v14  }
  0x27   :  { %471 = vperm.xlu2 %469, %v470_v14  }
  0x29   :  { %453 = vperm.xlu0 %451, %v446_v9  }
  0x2f   :  { %476 = vperm.xlu2 %469, %v464_v10  }
  0x31   :  { %481 = vperm.xlu0 %451, %v480_v17  }
  0x37   :  { %486 = vperm.xlu2 %469, %v480_v17  }
  0x39   :  { %491 = vset.pattern.permute.xlu0 %v551_v18 }
  0x3f   :  { %490 = vset.pattern.permute.xlu2 %v551_v18 }
  0x71   :  { %v466_v19 = vpop.permute.xlu2 %465 }
  0x72   :  { %v468_v21 = vunpack.i.h.bf16 %v466_v19  ;;  %v467_v22 = vunpack.i.l.bf16 %v466_v19 }
  0x74   :  { %v180_v27 = vpack.c.bf16 %v468_v21, %v468_v21  ;;  %v178_v28 = vpack.c.bf16 %v467_v22, %v467_v22  ;;  %v406_v21 = vunpack.c.l.bf16 %v582_v54 }
  0x76   :  { %v212_v33 = vunpack.c.l.bf16 %v180_v27  ;;  %v210_v34 = vunpack.c.l.bf16 %v178_v28 }
  0x78   :  { %v228_v46 = vmul.f32 %v422_v31, %v212_v33  ;;  %v226_v47 = vmul.f32 %v418_v30, %v210_v34 }
  0x80   :  { %v361_v24 = vpop.xlane.xlu1 %360 }
  0x81   :  { %v472_v20 = vpop.permute.xlu2 %471  ;;  %v362_v29 = vadd.f32 %v361_v24, %v357_v23 }
  0x82   :  { %v474_v37 = vunpack.i.h.bf16 %v472_v20  ;;  %v473_v43 = vunpack.i.l.bf16 %v472_v20  ;;  %v402_v20 = vunpack.c.l.bf16 %v580_v53 }
  0x83   :  { %364 = vst.msk [vmem:[#allocation3] sm:$0xff] %vm47_vm2, %v362_v29 }
  0x84   :  { %v177_v52 = vpack.c.bf16 %v474_v37, %v474_v37  ;;  %v175_v58 = vpack.c.bf16 %v473_v43, %v473_v43 }
  0x86   :  { %v209_v8 = vunpack.c.l.bf16 %v177_v52  ;;  %v207_v9 = vunpack.c.l.bf16 %v175_v58 }
  0x88   :  { %v599_v24 = vmul.f32 %v415_v1, %v209_v8  ;;  %v601_v25 = vmul.f32 %v411_v62, %v207_v9 }
  0x89   :  { %v477_v32 = vpop.permute.xlu2 %476 }
  0x8a   :  { %v479_v35 = vunpack.i.h.bf16 %v477_v32  ;;  %v478_v36 = vunpack.i.l.bf16 %v477_v32  ;;  %v368_v55 = vld [vmem:[#allocation3] sm:$0xff] }
  0x8b   :  { %v448_v38 = vpop.permute.xlu0 %447  ;;  %v584_v61 = vmax.f32 %v368_v55, 1e-09  ;;  %v609_v32 = vld [vmem:[#allocation6 + $0x30] sm:$0xff]  }
  0x8c   :  { %v181_v41 = vpack.c.bf16 %v479_v35, %v479_v35  ;;  %v179_v42 = vpack.c.bf16 %v478_v36, %v478_v36  ;;  %v450_v44 = vunpack.i.h.bf16 %v448_v38  ;;  %v449_v45 = vunpack.i.l.bf16 %v448_v38  ;;  %v611_v36 = vld [vmem:[#allocation6 + $0x38] sm:$0xff]  }
  0x8d   :  { %492 = vrcp.f32 %v584_v61  ;;  %v379_v13 = vand.u32 2147483647, %v584_v61  ;;  %v381_v19 = vand.u32 2147483648, %v584_v61  ;;  %vm375_vm3 = vweird.f32 %v584_v61 }
  0x8e   :  { %v213_v48 = vunpack.c.l.bf16 %v181_v41  ;;  %v211_v49 = vunpack.c.l.bf16 %v179_v42  ;;  %v173_v59 = vpack.c.bf16 %v450_v44, %v450_v44  ;;  %v171_v60 = vpack.c.bf16 %v449_v45, %v449_v45 }
  0x8f   :  { %vm605_vm4 = vcmp.eq.f32.partialorder %v379_v13, 8.507059e+37  ;;  %v414_v44 = vunpack.c.l.bf16 %v578_v51  ;;  %v427_v45 = vunpack.c.h.bf16 %v609_v32  ;;  %v430_v62 = vunpack.c.l.bf16 %v611_v36 }
  0x90   :  { %v229_v56 = vmul.f32 %v423_v40, %v213_v48  ;;  %v227_v57 = vmul.f32 %v419_v39, %v211_v49  ;;  %v205_v10 = vunpack.c.l.bf16 %v173_v59  ;;  %v203_v11 = vunpack.c.l.bf16 %v171_v60 }
  0x91   :  { %v487_v12 = vpop.permute.xlu2 %486  ;;  %v382_v39 = vor.u32 1.1754944e-38, %v381_v19  ;;  %v410_v40 = vunpack.c.l.bf16 %v576_v50  ;;  %v431_v49 = vunpack.c.h.bf16 %v611_v36  ;;  %v426_v60 = vunpack.c.l.bf16 %v609_v32 }
  0x92   :  { %v239_v63 = vpack.c.bf16 %v229_v56, %v228_v46  ;;  %v238_v0 = vpack.c.bf16 %v227_v57, %v226_v47  ;;  %v489_v22 = vunpack.i.h.bf16 %v487_v12  ;;  %v221_v26 = vmul.f32 %v407_v3, %v205_v10 }
  0x93   :  { %v493_v23 = vpop.eup %492  ;;  %v219_v27 = vmul.f32 %v403_v2, %v203_v11  ;;  %v488_v41 = vunpack.i.l.bf16 %v487_v12 }
  0x94   :  { %v253_v4 = vunpack.c.l.bf16 %v239_v63  ;;  %v254_v5 = vunpack.c.h.bf16 %v239_v63  ;;  %v251_v6 = vunpack.c.l.bf16 %v238_v0  ;;  %v252_v7 = vunpack.c.h.bf16 %v238_v0 }
  0x95   :  { %v371_v28 = vmul.f32 %v493_v23, %v584_v61  ;;  %v185_v37 = vpack.c.bf16 %v489_v22, %v489_v22  ;;  %vm376_vm5 = vweird.f32 %v493_v23  ;;  %v183_v58 = vpack.c.bf16 %v488_v41, %v488_v41 }
  0x96   :  { %v296_v14 = vsel %vm45_vm1, %v251_v6, 0.0  ;;  %v297_v15 = vsel %vm45_vm1, %v252_v7, 0.0  ;;  %v305_v16 = vsel %vm45_vm1, %v253_v4, 0.0  ;;  %v306_v17 = vsel %vm45_vm1, %v254_v5, 0.0  ;;  %vm377_vm6 = vmor %vm375_vm3, %vm376_vm5 }
  0x97   :  { %v298_v18 = vadd.f32 %v297_v15, %v296_v14  ;;  %v307_v30 = vadd.f32 %v306_v17, %v305_v16  ;;  %v372_v38 = vsub.f32 1.0, %v371_v28  ;;  %v217_v55 = vunpack.c.l.bf16 %v185_v37 }
  0x98   :  { %v460_v48 = vpop.permute.xlu1 %459  ;;  %v215_v10 = vunpack.c.l.bf16 %v183_v58 }
  0x99   :  { %v299_v33 = vrot.slane %v298_v18, 4  ;;  %v373_v46 = vmul.f32 %v493_v23, %v372_v38  ;;  %v308_v47 = vrot.slane %v307_v30, 4  ;;  %v462_v50 = vunpack.i.h.bf16 %v460_v48 }
  0x9a   :  { %v461_v57 = vunpack.i.l.bf16 %v460_v48  ;;  %v233_v61 = vmul.f32 %v431_v49, %v217_v55  ;;  %v231_v36 = vmul.f32 %v427_v45, %v215_v10 }
  0x9b   :  { %v454_v31 = vpop.permute.xlu0 %453  ;;  %v617_v52 = vadd.f32 %v299_v33, %v298_v18  ;;  %v374_v56 = vadd.f32 %v493_v23, %v373_v46  ;;  %v623_v0 = vadd.f32 %v308_v47, %v307_v30  ;;  %v176_v1 = vpack.c.bf16 %v462_v50, %v462_v50 }
  0x9c   :  { %v456_v34 = vunpack.i.h.bf16 %v454_v31  ;;  %v455_v35 = vunpack.i.l.bf16 %v454_v31  ;;  %v174_v2 = vpack.c.bf16 %v461_v57, %v461_v57 }
  0x9d   :  { %v378_v63 = vsel %vm377_vm6, %v493_v23, %v374_v56  ;;  %v301_v5 = vrot.slane %v617_v52, 2  ;;  %v208_v8 = vunpack.c.l.bf16 %v176_v1 }
  0x9e   :  { %v172_v42 = vpack.c.bf16 %v456_v34, %v456_v34  ;;  %v170_v43 = vpack.c.bf16 %v455_v35, %v455_v35  ;;  %v383_v4 = vsel %vm605_vm4, %v382_v39, %v378_v63  ;;  %v206_v9 = vunpack.c.l.bf16 %v174_v2 }
  0x9f   :  { %387 = vperm.xlu2 %490, %v383_v4   ;;  %v224_v17 = vmul.f32 %v414_v44, %v208_v8  ;;  %v302_v55 = vadd.f32 %v301_v5, %v617_v52 }
  0xa0   :  { %v204_v53 = vunpack.c.l.bf16 %v172_v42  ;;  %v202_v54 = vunpack.c.l.bf16 %v170_v43  ;;  %v222_v18 = vmul.f32 %v410_v40, %v206_v9 }
  0xa1   :  { %v237_v28 = vpack.c.bf16 %v599_v24, %v224_v17 }
  0xa2   :  { %v220_v51 = vmul.f32 %v406_v21, %v204_v53  ;;  %v218_v59 = vmul.f32 %v402_v20, %v202_v54  ;;  %v236_v30 = vpack.c.bf16 %v601_v25, %v222_v18  ;;  %v310_v54 = vrot.slane %v623_v0, 2 }
  0xa3   :  { %v482_v3 = vpop.permute.xlu0 %481  ;;  %v249_v34 = vunpack.c.l.bf16 %v237_v28  ;;  %v250_v35 = vunpack.c.h.bf16 %v237_v28 }
  0xa4   :  { %v234_v6 = vpack.c.bf16 %v219_v27, %v218_v59  ;;  %v235_v7 = vpack.c.bf16 %v221_v26, %v220_v51  ;;  %v484_v13 = vunpack.i.h.bf16 %v482_v3  ;;  %v483_v14 = vunpack.i.l.bf16 %v482_v3 }
  0xa5   :  { %v247_v38 = vunpack.c.l.bf16 %v236_v30  ;;  %v248_v39 = vunpack.c.h.bf16 %v236_v30  ;;  %v287_v42 = vsel %vm45_vm1, %v249_v34, 0.0  ;;  %v288_v43 = vsel %vm45_vm1, %v250_v35, 0.0 }
  0xa6   :  { %v243_v11 = vunpack.c.l.bf16 %v234_v6  ;;  %v244_v12 = vunpack.c.h.bf16 %v234_v6  ;;  %v245_v15 = vunpack.c.l.bf16 %v235_v7  ;;  %v246_v16 = vunpack.c.h.bf16 %v235_v7 }
  0xa7   :  { %v184_v21 = vpack.c.bf16 %v484_v13, %v484_v13  ;;  %v182_v22 = vpack.c.bf16 %v483_v14, %v483_v14  ;;  %v289_v46 = vadd.f32 %v288_v43, %v287_v42  ;;  %v278_v25 = vsel %vm45_vm1, %v247_v38, 0.0  ;;  %v242_v42 = vld [vmem:[#allocation2] sm:$0xff] }
  0xa8   :  { %v260_v19 = vsel %vm45_vm1, %v243_v11, 0.0  ;;  %v261_v20 = vsel %vm45_vm1, %v244_v12, 0.0  ;;  %v269_v26 = vsel %vm45_vm1, %v245_v15, 0.0  ;;  %v270_v27 = vsel %vm45_vm1, %v246_v16, 0.0 }
  0xa9   :  { %v262_v23 = vadd.f32 %v261_v20, %v260_v19  ;;  %v271_v29 = vadd.f32 %v270_v27, %v269_v26  ;;  %v216_v31 = vunpack.c.l.bf16 %v184_v21  ;;  %v214_v32 = vunpack.c.l.bf16 %v182_v22 }
  0xaa   :  { %v279_v47 = vsel %vm45_vm1, %v248_v39, 0.0  ;;  %v290_v50 = vrot.slane %v289_v46, 4  ;;  %v311_v5 = vadd.f32 %v310_v54, %v623_v0  ;;  %v303_v16 = vrot.slane %v302_v55, 1 }
  0xab   :  { %v263_v33 = vrot.slane %v262_v23, 4  ;;  %v272_v37 = vrot.slane %v271_v29, 4  ;;  %v232_v40 = vmul.f32 %v430_v62, %v216_v31  ;;  %v230_v44 = vmul.f32 %v426_v60, %v214_v32 }
  0xac   :  { %v280_v49 = vadd.f32 %v279_v47, %v278_v25  ;;  %v291_v62 = vadd.f32 %v290_v50, %v289_v46  ;;  %v312_v21 = vrot.slane %v311_v5, 1  ;;  %v304_v28 = vadd.f32 %v303_v16, %v302_v55 }
  0xad   :  { %v264_v41 = vadd.f32 %v263_v33, %v262_v23  ;;  %v273_v24 = vadd.f32 %v272_v37, %v271_v29  ;;  %v241_v53 = vpack.c.bf16 %v233_v61, %v232_v40  ;;  %v240_v45 = vpack.c.bf16 %v231_v36, %v230_v44 }
  0xae   :  { %v281_v58 = vrot.slane %v280_v49, 4  ;;  %v292_v7 = vrot.slane %v291_v62, 2  ;;  %v313_v32 = vadd.f32 %v312_v21, %v311_v5 }
  0xaf   :  { %v265_v48 = vrot.slane %v264_v41, 2  ;;  %v274_v56 = vrot.slane %v273_v24, 2  ;;  %v257_v51 = vunpack.c.l.bf16 %v241_v53  ;;  %v258_v59 = vunpack.c.h.bf16 %v241_v53 }
  0xb0   :  { %v255_v63 = vunpack.c.l.bf16 %v240_v45  ;;  %v256_v1 = vunpack.c.h.bf16 %v240_v45  ;;  %v282_v3 = vadd.f32 %v281_v58, %v280_v49  ;;  %v293_v13 = vadd.f32 %v292_v7, %v291_v62 }
  0xb1   :  { %v266_v57 = vadd.f32 %v265_v48, %v264_v41  ;;  %v275_v60 = vadd.f32 %v274_v56, %v273_v24  ;;  %v323_v4 = vsel %vm45_vm1, %v257_v51, 0.0  ;;  %v324_v6 = vsel %vm45_vm1, %v258_v59, 0.0 }
  0xb2   :  { %v325_v8 = vadd.f32 %v324_v6, %v323_v4  ;;  %v314_v52 = vsel %vm45_vm1, %v255_v63, 0.0  ;;  %v283_v10 = vrot.slane %v282_v3, 2  ;;  %v315_v11 = vsel %vm45_vm1, %v256_v1, 0.0 }
  0xb3   :  { %v267_v2 = vrot.slane %v266_v57, 1  ;;  %v276_v61 = vrot.slane %v275_v60, 1  ;;  %v316_v15 = vadd.f32 %v315_v11, %v314_v52  ;;  %v294_v18 = vrot.slane %v293_v13, 1 }
  0xb4   :  { %v326_v14 = vrot.slane %v325_v8, 4  ;;  %v284_v17 = vadd.f32 %v283_v10, %v282_v3 }
  0xb5   :  { %v268_v9 = vadd.f32 %v267_v2, %v266_v57  ;;  %v277_v12 = vadd.f32 %v276_v61, %v275_v60  ;;  %v317_v20 = vrot.slane %v316_v15, 4  ;;  %v295_v26 = vadd.f32 %v294_v18, %v293_v13 }
  0xb6   :  { %v327_v19 = vadd.f32 %v326_v14, %v325_v8  ;;  %v285_v22 = vrot.slane %v284_v17, 1 }
  0xb7   :  { %v341_v23 = vsel %vm340_vm7, %v277_v12, %v268_v9  ;;  %v318_v27 = vadd.f32 %v317_v20, %v316_v15 }
  0xb8   :  { %v328_v0 = vrot.slane %v327_v19, 2  ;;  %v286_v29 = vadd.f32 %v285_v22, %v284_v17 }
  0xb9   :  { %v319_v31 = vrot.slane %v318_v27, 2 }
  0xba   :  { %v329_v30 = vadd.f32 %v328_v0, %v327_v19  ;;  %v343_v33 = vsel %vm342_vm8, %v286_v29, %v341_v23 }
  0xbb   :  { %v345_v34 = vsel %vm344_vm9, %v295_v26, %v343_v33  ;;  %v320_v36 = vadd.f32 %v319_v31, %v318_v27 }
  0xbc   :  { %v330_v35 = vrot.slane %v329_v30, 1  ;;  %v347_v37 = vsel %vm346_vm10, %v304_v28, %v345_v34 }
  0xbd   :  { %v321_v38 = vrot.slane %v320_v36, 1  ;;  %v349_v40 = vsel %vm348_vm11, %v313_v32, %v347_v37 }
  0xbe   :  { %v331_v39 = vadd.f32 %v330_v35, %v329_v30 }
  0xbf   :  { %v322_v41 = vadd.f32 %v321_v38, %v320_v36 }
  0xc1   :  { %v351_v43 = vsel %vm350_vm12, %v322_v41, %v349_v40 }
  0xc2   :  { %v353_v44 = vsel %vm352_vm13, %v331_v39, %v351_v43 }
  0xc3   :  { %v355_v24 = vadd.f32 %v353_v44, %v242_v42 }
  0xc5   :  { %356 = vst.msk [vmem:[#allocation2] sm:$0xff] %vm45_vm1, %v355_v24 }
  0xcc   :  { %v384_v25 = vld [vmem:[#allocation2] sm:$0xff] }
  0xf9   :  { %v388_v46 = vpop.permute.xlu2 %387 }
  0xfa   :  { %v390_v47 = vmul.f32 %v388_v46, %v384_v25 }
  0xfc   :  { %v391_v48 = vpack.c.bf16 %v390_v47, %v390_v47 }
  0xfe   :  { %393 = vst.msk [vmem:[%s651_s2] sm:$0xf] %vm392_vm14, %v391_v48 }
  0xff   :  { %398 = vsyncpa [#allocation5], 1 }
 0x100   :  { %399 = vsyncpa [#allocation7], 1 }

</bundles_post_ra>
